<compile_context>
chip_gen: v7x
topology: tpu7x:2x2x1
jax: 0.10.0
libtpu: 0.0.40
codegen_flags: <defaults>
</compile_context>

<pallas_src>
import functools

import numpy as np
import jax
import jax.numpy as jnp
from jax import lax
from jax.experimental import pallas as pl
from jax.experimental.pallas import tpu as pltpu

BN_EPS = 1e-5


# --------------------------- roll-convention probe ---------------------------

def _probe_roll_sign():
    """Return s so that pltpu.roll(x, (s*d) % M, axis=0)[i] == x[(i+d) % M]."""
    x = jnp.arange(8 * 128, dtype=jnp.float32).reshape(8, 128)

    def k(x_ref, o_ref):
        o_ref[...] = pltpu.roll(x_ref[...], 1, 0)

    y = pl.pallas_call(
        k,
        out_shape=jax.ShapeDtypeStruct((8, 128), jnp.float32),
        grid=(1,),
        in_specs=[pl.BlockSpec((8, 128), lambda i: (0, 0))],
        out_specs=pl.BlockSpec((8, 128), lambda i: (0, 0)),
    )(x)
    # jnp.roll(x, 1, 0)[i] == x[i-1]; if pltpu.roll matches, shifting by -d
    # fetches row i+d, so the sign is -1.  Otherwise use +1.
    return -1 if bool(jnp.array_equal(y, jnp.roll(x, 1, 0))) else 1


def _shift_rows(x, d, roll_sign):
    """Return t with t[i] = x[(i + d) % M] (flat-row shift via XLU rotate)."""
    if d == 0:
        return x
    m = x.shape[0]
    return pltpu.roll(x, (roll_sign * d) % m, 0)


# ------------------------------ in-kernel helpers ----------------------------

def _edge_masks(N, H, W):
    """Boolean (M,1) masks that emulate zero padding for the 3x3 taps."""
    M = N * H * W
    row = lax.broadcasted_iota(jnp.int32, (M, 1), 0)
    wpos = row % W
    hpos = (row // W) % H
    hmask = (hpos >= 1, None, hpos <= H - 2)
    wmask = (wpos >= 1, None, wpos <= W - 2)
    return hmask, wmask


def _conv3x3_bn_relu(x, w_ref, gamma, beta, masks, W, roll_sign):
    """Conv3x3(pad=1) + train-mode BatchNorm + ReLU on a flat (n,h,w) slab.

    x      : (M, Cin)  f32 value, rows ordered (n, h, w) row-major
    w_ref  : (9, Cin, Cout) bf16 VMEM ref, tap index k = ky*3 + kx
    gamma  : (1, Cout) f32    beta : (1, Cout) f32
    The conv bias is omitted: BN mean subtraction cancels it exactly.
    """
    hmask, wmask = masks
    cout = w_ref.shape[2]
    acc = jnp.zeros((x.shape[0], cout), jnp.float32)
    for ky in range(3):
        for kx in range(3):
            d = (ky - 1) * W + (kx - 1)                 # flat row offset of tap
            tap = _shift_rows(x, d, roll_sign).astype(jnp.bfloat16)
            m = hmask[ky]
            if wmask[kx] is not None:
                m = wmask[kx] if m is None else jnp.logical_and(m, wmask[kx])
            if m is not None:                            # zero out-of-image rows
                tap = jnp.where(m, tap, jnp.zeros_like(tap))
            acc = acc + jnp.dot(tap, w_ref[ky * 3 + kx],
                                preferred_element_type=jnp.float32)

    mean = jnp.mean(acc, axis=0, keepdims=True)          # batch stats over N*H*W
    var = jnp.mean(jnp.square(acc - mean), axis=0, keepdims=True)
    y = (acc - mean) * lax.rsqrt(var + BN_EPS) * gamma + beta
    return jnp.maximum(y, 0.0)


def _avg_pool_2x2(y, p, N, H, W):
    """AvgPool2d(2) as a per-sample pooling matrix (O(N) work and memory)."""
    C = y.shape[1]
    Ho, Wo = H // 2, W // 2
    y3 = y.reshape(N, H * W, C).astype(jnp.bfloat16)
    pb = jnp.broadcast_to(p, (N, Ho * Wo, H * W))
    o3 = jnp.einsum("nop,npc->noc", pb, y3, preferred_element_type=jnp.float32)
    return o3.reshape(N * Ho * Wo, C)


# ------------------------------- fused kernel --------------------------------

def _discriminator_kernel(x_ref,
                          w1_ref, g1_ref, b1_ref,
                          w2_ref, g2_ref, b2_ref,
                          w3_ref, g3_ref, b3_ref,
                          w4_ref, g4_ref, b4_ref,
                          g5_ref, b5_ref,
                          g6_ref, b6_ref,
                          p1_ref, p2_ref,
                          wo_ref, bo_ref,
                          w5_hbm_ref, w6_hbm_ref,
                          out_ref,
                          w5_buf, w6_buf, dma_sem,
                          *, N, H, W, roll_sign):
    # Prefetch the two biggest weight tensors (c4a, c4b) HBM -> VMEM while the
    # early layers compute; they are only waited on right before use.
    cp5 = pltpu.make_async_copy(w5_hbm_ref, w5_buf, dma_sem.at[0])
    cp6 = pltpu.make_async_copy(w6_hbm_ref, w6_buf, dma_sem.at[1])
    cp5.start()
    cp6.start()

    # cv1, cv2 at full resolution.
    masks = _edge_masks(N, H, W)
    y = _conv3x3_bn_relu(x_ref[...], w1_ref, g1_ref[...], b1_ref[...],
                         masks, W, roll_sign)
    y = _conv3x3_bn_relu(y, w2_ref, g2_ref[...], b2_ref[...],
                         masks, W, roll_sign)

    # cv3: AvgPool(2) then two conv blocks at H/2 x W/2.
    y = _avg_pool_2x2(y, p1_ref[...], N, H, W)
    H, W = H // 2, W // 2
    masks = _edge_masks(N, H, W)
    y = _conv3x3_bn_relu(y, w3_ref, g3_ref[...], b3_ref[...],
                         masks, W, roll_sign)
    y = _conv3x3_bn_relu(y, w4_ref, g4_ref[...], b4_ref[...],
                         masks, W, roll_sign)

    # cv4: AvgPool(2) then two conv blocks at H/4 x W/4 (prefetched weights).
    y = _avg_pool_2x2(y, p2_ref[...], N, H, W)
    H, W = H // 2, W // 2
    masks = _edge_masks(N, H, W)
    cp5.wait()
    y = _conv3x3_bn_relu(y, w5_buf, g5_ref[...], b5_ref[...],
                         masks, W, roll_sign)
    cp6.wait()
    y = _conv3x3_bn_relu(y, w6_buf, g6_ref[...], b6_ref[...],
                         masks, W, roll_sign)

    # Final Conv2d(256 -> 1, kernel 1x1) as a lane-reduction epilogue.
    out_ref[...] = jnp.sum(y * wo_ref[...], axis=1, keepdims=True) + bo_ref[...]


# ------------------------------ host-side wrapper -----------------------------

def _pool_matrix(H, W):
    """Per-sample (Ho*Wo, H*W) 2x2 average-pooling matrix (batch independent)."""
    Ho, Wo = H // 2, W // 2
    P = np.zeros((Ho * Wo, H * W), np.float32)
    for ho in range(Ho):
        for wo in range(Wo):
            for dh in range(2):
                for dw in range(2):
                    P[ho * Wo + wo, (2 * ho + dh) * W + (2 * wo + dw)] = 0.25
    return jnp.asarray(P, dtype=jnp.bfloat16)


def prepack_params(params, H=16, W=16):
    """One-time weight packing (done OUTSIDE the jitted forward).

    Conv weights: (Cout,Cin,3,3) f32 -> (9,Cin,Cout) bf16 (tap k = ky*3+kx).
    The conv bias is dropped (cancelled exactly by train-mode BN).
    """
    def pack_conv(layer):
        w = layer["w"]
        cout, cin = w.shape[0], w.shape[1]
        wp = jnp.transpose(w, (2, 3, 1, 0)).reshape(9, cin, cout).astype(jnp.bfloat16)
        g = layer["gamma"].reshape(1, cout).astype(jnp.float32)
        b = layer["beta"].reshape(1, cout).astype(jnp.float32)
        return wp, g, b

    packed = {name: pack_conv(params[name])
              for name in ("c1", "c2", "c3a", "c3b", "c4a", "c4b")}
    packed["out_w"] = params["out_w"].reshape(1, -1).astype(jnp.float32)
    packed["out_b"] = params["out_b"].reshape(1, 1).astype(jnp.float32)
    packed["p1"] = _pool_matrix(H, W)            # 16x16 -> 8x8
    packed["p2"] = _pool_matrix(H // 2, W // 2)  # 8x8   -> 4x4
    return packed


def discriminator_forward(packed, x_nchw, *, roll_sign):
    N, Cin, H, W = x_nchw.shape
    M = N * H * W
    x = jnp.transpose(x_nchw, (0, 2, 3, 1)).reshape(M, Cin).astype(jnp.float32)

    (w1, g1, b1) = packed["c1"]
    (w2, g2, b2) = packed["c2"]
    (w3, g3, b3) = packed["c3a"]
    (w4, g4, b4) = packed["c3b"]
    (w5, g5, b5) = packed["c4a"]
    (w6, g6, b6) = packed["c4b"]
    p1, p2 = packed["p1"], packed["p2"]
    wo, bo = packed["out_w"], packed["out_b"]

    Ho, Wo = H // 4, W // 4
    Mo = N * Ho * Wo

    def full(a):
        return pl.BlockSpec(a.shape, lambda i, nd=a.ndim: (0,) * nd)

    out_flat = pl.pallas_call(
        functools.partial(_discriminator_kernel, N=N, H=H, W=W,
                          roll_sign=roll_sign),
        out_shape=jax.ShapeDtypeStruct((Mo, 1), jnp.float32),
        grid=(1,),
        in_specs=[full(x),
                  full(w1), full(g1), full(b1),
                  full(w2), full(g2), full(b2),
                  full(w3), full(g3), full(b3),
                  full(w4), full(g4), full(b4),
                  full(g5), full(b5),
                  full(g6), full(b6),
                  full(p1), full(p2),
                  full(wo), full(bo),
                  pl.BlockSpec(memory_space=pl.ANY),    # c4a weights (HBM)
                  pl.BlockSpec(memory_space=pl.ANY)],   # c4b weights (HBM)
        out_specs=pl.BlockSpec((Mo, 1), lambda i: (0, 0)),
        scratch_shapes=[pltpu.VMEM(w5.shape, jnp.bfloat16),
                        pltpu.VMEM(w6.shape, jnp.bfloat16),
                        pltpu.SemaphoreType.DMA((2,))],
        compiler_params=pltpu.CompilerParams(
            dimension_semantics=("arbitrary",),
            vmem_limit_bytes=40 * 1024 * 1024),
    )(x, w1, g1, b1, w2, g2, b2, w3, g3, b3, w4, g4, b4,
      g5, b5, g6, b6, p1, p2, wo, bo, w5, w6)

    return jnp.transpose(out_flat.reshape(N, Ho, Wo, 1), (0, 3, 1, 2))


# --------------------------- reference & parameters ---------------------------

def _reference_forward(params, x):
    """Pure-JAX f32 reference with identical (train-mode BN) semantics."""
    def conv_bn_relu(x, layer):
        y = lax.conv_general_dilated(
            x, layer["w"], window_strides=(1, 1), padding="SAME",
            dimension_numbers=("NCHW", "OIHW", "NCHW"))
        y = y + layer["b"].reshape(1, -1, 1, 1)
        mean = jnp.mean(y, axis=(0, 2, 3), keepdims=True)
        var = jnp.mean(jnp.square(y - mean), axis=(0, 2, 3), keepdims=True)
        y = ((y - mean) * lax.rsqrt(var + BN_EPS)
             * layer["gamma"].reshape(1, -1, 1, 1)
             + layer["beta"].reshape(1, -1, 1, 1))
        return jnp.maximum(y, 0.0)

    def avg_pool2(x):
        n, c, h, w = x.shape
        return jnp.mean(x.reshape(n, c, h // 2, 2, w // 2, 2), axis=(3, 5))

    y = conv_bn_relu(x, params["c1"])
    y = conv_bn_relu(y, params["c2"])
    y = avg_pool2(y)
    y = conv_bn_relu(y, params["c3a"])
    y = conv_bn_relu(y, params["c3b"])
    y = avg_pool2(y)
    y = conv_bn_relu(y, params["c4a"])
    y = conv_bn_relu(y, params["c4b"])
    out = lax.conv_general_dilated(
        y, params["out_w"], window_strides=(1, 1), padding="VALID",
        dimension_numbers=("NCHW", "OIHW", "NCHW"))
    return out + params["out_b"].reshape(1, 1, 1, 1)


def init_params(key, in_ch):
    def nrm(k, shape, scale=0.05):
        return scale * jax.random.normal(k, shape, dtype=jnp.float32)

    specs = [("c1", in_ch, 32), ("c2", 32, 64),
             ("c3a", 64, 128), ("c3b", 128, 128),
             ("c4a", 128, 256), ("c4b", 256, 256)]
    params = {}
    cnt = 0
    for name, cin, cout in specs:
        ks = jax.random.split(jax.random.fold_in(key, cnt), 4)
        cnt += 1
        params[name] = {
            "w": nrm(ks[0], (cout, cin, 3, 3)),
            "b": nrm(ks[1], (cout,)),          # cancelled by train-mode BN
            "gamma": 1.0 + nrm(ks[2], (cout,)),
            "beta": nrm(ks[3], (cout,)),
        }
    ko = jax.random.split(jax.random.fold_in(key, cnt), 2)
    params["out_w"] = nrm(ko[0], (1, 256, 1, 1))
    params["out_b"] = nrm(ko[1], (1,))
    return params


if __name__ == "__main__":
    key = jax.random.PRNGKey(0)
    in_ch = 4
    x = jax.random.normal(jax.random.fold_in(key, 999), (2, in_ch, 16, 16),
                          dtype=jnp.float32)                     # NCHW like PyTorch
    params = init_params(key, in_ch)
    packed = prepack_params(params, H=16, W=16)                  # one-time packing

    roll_sign = _probe_roll_sign()                               # pin roll convention
    fwd = jax.jit(functools.partial(discriminator_forward, roll_sign=roll_sign))
    out = jax.block_until_ready(fwd(packed, x))

    assert out.shape == (2, 1, 4, 4), out.shape                  # 16 -> 8 -> 4
    assert out.dtype == jnp.float32
    assert bool(jnp.all(jnp.isfinite(out)))

    # Check against an f32 lax.conv reference (bf16 MXU inputs -> loose tol).
    ref = _reference_forward(params, x)
    err = float(jnp.max(jnp.abs(out - ref)))
    scale = float(jnp.max(jnp.abs(ref)))
    assert err <= 0.1 * (1.0 + scale), (err, scale)

    print("KERNEL_OK")
</pallas_src>

<mosaic_0001>
module attributes {stable_mosaic.version = 11 : i64} {
  func.func @k(%arg0: i32, %arg1: memref<8x128xf32, #tpu.memory_space<vmem>>, %arg2: memref<8x128xf32, #tpu.memory_space<vmem>>) attributes {dimension_semantics = [#tpu.dimension_semantics<arbitrary>], iteration_bounds = array<i64: 1>, scalar_prefetch = 0 : i64, scratch_operands = 0 : i64, tpu.core_type = #tpu.core_type<tc>, window_params = [{pipeline_mode = #tpu.pipeline_mode<synchronous>, transform_indices = @transform_0, window_bounds = array<i64: 8, 128>}, {pipeline_mode = #tpu.pipeline_mode<synchronous>, transform_indices = @transform_1, window_bounds = array<i64: 8, 128>}]} {
    %c0 = arith.constant 0 : index
    %c0_0 = arith.constant 0 : index
    %0 = vector.load %arg1[%c0, %c0_0] : memref<8x128xf32, #tpu.memory_space<vmem>>, vector<8x128xf32>
    %c1_i32 = arith.constant 1 : i32
    %1 = tpu.dynamic_rotate %0 by %c1_i32 dim 0 : vector<8x128xf32>, i32 -> vector<8x128xf32>
    %c0_1 = arith.constant 0 : index
    %c0_2 = arith.constant 0 : index
    %2 = vector.load %arg2[%c0_1, %c0_2] : memref<8x128xf32, #tpu.memory_space<vmem>>, vector<8x128xf32>
    tpu.vector_store %arg2[%c0_1, %c0_2], %1 {strides = array<i32>} : memref<8x128xf32, #tpu.memory_space<vmem>>, vector<8x128xf32>,
    return
  }
  func.func @transform_0(%arg0: i32) -> (i32, i32) {
    %c0_i32 = arith.constant 0 : i32
    %c0_i32_0 = arith.constant 0 : i32
    %c0_i32_1 = arith.constant 0 : i32
    return %c0_i32, %c0_i32_0 : i32, i32
  }
  func.func @transform_1(%arg0: i32) -> (i32, i32) {
    %c0_i32 = arith.constant 0 : i32
    %c0_i32_0 = arith.constant 0 : i32
    %c0_i32_1 = arith.constant 0 : i32
    return %c0_i32, %c0_i32_0 : i32, i32
  }
}

</mosaic_0001>

<bundles_post_ra>
// kernel: tpu_custom_call.1
= control target key start
LH: loop header
LB: loop body
LE: loop exit
PB: predicated region body
PF: predicated region fallthrough
CT: control target
= control target key end

     0   :  { %6 = vsyncpa [#allocation3], 0  ;;  %s125_s0 = inlined_call_operand.hbm [shape: f32[8,128], index: 0, kind: input, shape index: {}]   ;;  %s126_s1 = inlined_call_operand.hbm [shape: f32[8,128], index: 1, kind: output, shape index: {}]  }
   0x1   :  { %7 = vsyncpa [#allocation4], 0  ;;  %s89_s6 = smov [#allocation2]   ;;  %s41_s10 = scalar_lea.hbm %s125_s0, 128 }
   0x2   :  { %s14_s7 = sshll.u32 %s89_s6, 4  ;;  %p42_p0 = scmp.ne.s32.totalorder %s125_s0, %s41_s10  ;;  %s15_s7 = int_to_ptr.vmem [resolvable:$true] %s14_s7 }
   0x3   :  { %p45_p1 = scmp.lt.u32.totalorder %s41_s10, %s125_s0 }
   0x5   :  { %p47_p2 = pnand %p45_p1, %p42_p0 }
   0x7   :  { %50 = shalt.err (!%p47_p2)
}
   0x8   :  { %s51_s15 = scalar_lea.vmem %s15_s7, 128  ;;  %p56_p4 = scmp.lt.s32.totalorder %s15_s7, %s15_s7 }
   0x9   :  { %p52_p3 = scmp.ne.s32.totalorder %s15_s7, %s51_s15  ;;  %p57_p5 = scmp.lt.s32.totalorder %s51_s15, %s51_s15 }
   0xb   :  { %p58_p6 = por %p57_p5, %p56_p4 }
   0xd   :  { %p59_p7 = pnand %p58_p6, %p52_p3 }
   0xf   :  { %62 = shalt.err (!%p59_p7)
}
  0x10   :  { %17 = dma.hbm_to_vmem [thread:$0]  %s125_s0, 128, %s15_s7, [#allocation3]  }
  0x11   :  { %85 = dma.done.wait [#allocation3], 128  }
  0x12   :  { %86 = vsyncadd [#allocation3], 4294967168  ;;  %s90_s18 = smov [#allocation5]   ;;  %v21_v0 = vld [vmem:[#allocation2] sm:$0xff] }
  0x13   :  { %s30_s19 = sshll.u32 %s90_s18, 4  ;;  %v22_v1 = vrot.slane %v21_v0, 7  ;;  %s31_s19 = int_to_ptr.vmem [resolvable:$true] %s30_s19 }
  0x14   :  { %s63_s20 = scalar_lea.vmem %s31_s19, 128  ;;  %p68_p9 = scmp.lt.s32.totalorder %s31_s19, %s31_s19 }
  0x15   :  { %23 = vst [vmem:[#allocation5] sm:$0xff] %v22_v1  ;;  %p64_p8 = scmp.ne.s32.totalorder %s31_s19, %s63_s20  ;;  %p69_p10 = scmp.lt.s32.totalorder %s63_s20, %s63_s20 }
  0x17   :  { %p70_p11 = por %p69_p10, %p68_p9 }
  0x19   :  { %p71_p12 = pnand %p70_p11, %p64_p8 }
  0x1b   :  { %74 = shalt.err (!%p71_p12)
}
  0x1c   :  { %s75_s23 = scalar_lea.hbm %s126_s1, 128 }
  0x1d   :  { %p76_p13 = scmp.ne.s32.totalorder %s126_s1, %s75_s23  ;;  %p79_p0 = scmp.lt.u32.totalorder %s75_s23, %s126_s1 }
  0x1f   :  { %p81_p1 = pnand %p79_p0, %p76_p13 }
  0x21   :  { %84 = shalt.err (!%p81_p1)
}
  0x22   :  { %33 = dma.vmem_to_hbm [thread:$0]  %s31_s19, 128, %s126_s1, [#allocation4]  }
  0x23   :  { %87 = dma.done.wait [#allocation4], 128  }
  0x24   :  { %88 = vsyncadd [#allocation4], 4294967168 }
  0x25   :  { %37 = vsyncpa [#allocation3], 1 }
  0x26   :  { %38 = vsyncpa [#allocation4], 1 }

</bundles_post_ra>
